<compile_context>
chip_gen: v7x
topology: tpu7x:2x2x1
jax: 0.10.0
libtpu: 0.0.40
codegen_flags: <defaults>
</compile_context>

<pallas_src>
import functools

import jax
import jax.numpy as jnp
import numpy as np
from jax import lax
from jax.experimental import pallas as pl
from jax.experimental.pallas import tpu as pltpu

LANE = 128

MOBILENET_BLOCKS = [
    (32, 64, 1), (64, 128, 2), (128, 128, 1), (128, 256, 2), (256, 256, 1),
    (256, 512, 2), (512, 512, 1), (512, 512, 1), (512, 512, 1), (512, 512, 1),
    (512, 512, 1), (512, 1024, 2), (1024, 1024, 1),
]


def _round_up(v, m):
    return (v + m - 1) // m * m


def _pick_cout_tile(cout_p):
    # 256-wide output tile feeds the 256-wide MXU on v6e/v7x; 128 otherwise.
    return 256 if cout_p % 256 == 0 else 128


# ---------------------------------------------------------------------------
# Fused depthwise-separable conv block
# ---------------------------------------------------------------------------
def _dsconv_kernel(x_ref, wdw_ref, b1_ref, wpw_ref, b2_ref, o_ref, dw_ref, *,
                   stride, ho, wo):
    """One batch element / one Cout tile of a DepthwiseSeparableConv block.

    x_ref  : (1, s*Hh, s*Wh, Cin_p) parity de-interleaved, zero-padded input
    wdw_ref: (9, Cin_p)             depthwise 3x3 weights * BN scale
    b1_ref : (1, Cin_p)             folded BN bias (depthwise branch)
    wpw_ref: (Cin_p, TCO) bf16      pointwise 1x1 weights * BN scale
    b2_ref : (1, TCO)               folded BN bias (pointwise branch)
    o_ref  : (1, Ho*Wo, TCO)        lane-dense output tile
    dw_ref : (Ho*Wo, Cin_p) bf16    VMEM scratch: ReLU6'd depthwise activations
    """
    co = pl.program_id(1)
    cin_p = wdw_ref.shape[1]
    hh = x_ref.shape[1] // stride
    wh = x_ref.shape[2] // stride

    # Depthwise branch depends only on the batch index: compute once per batch
    # element (co == 0, innermost grid axis) and reuse from VMEM scratch.
    @pl.when(co == 0)
    def _():
        w_all = wdw_ref[...]                               # hoisted out of taps
        bias1 = b1_ref[...].reshape(1, 1, cin_p)
        acc = jnp.zeros((ho, wo, cin_p), jnp.float32)
        for ky in range(3):
            py, dy = ky % stride, ky // stride
            for kx in range(3):
                px, dx = kx % stride, kx // stride
                tap = x_ref[0,
                            pl.ds(py * hh + dy, ho),
                            pl.ds(px * wh + dx, wo), :]
                w = w_all[ky * 3 + kx].reshape(1, 1, cin_p)
                acc = acc + tap.astype(jnp.float32) * w
        dw = jnp.clip(acc + bias1, 0.0, 6.0)
        if wo % 8 == 0:
            # sublane-aligned: single flattening reshape + store
            dw_ref[...] = dw.reshape(ho * wo, cin_p).astype(jnp.bfloat16)
        else:
            # tiny late-stage spatial extents: stage row-by-row (no reshape)
            for r in range(ho):
                dw_ref[pl.ds(r * wo, wo), :] = dw[r].astype(jnp.bfloat16)

    # Pointwise 1x1 conv == channel matmul on the MXU (bf16 in, f32 accumulate)
    pw = jnp.dot(dw_ref[...], wpw_ref[...], preferred_element_type=jnp.float32)
    pw = jnp.clip(pw + b2_ref[...], 0.0, 6.0)
    o_ref[0] = pw.astype(o_ref.dtype)


def depthwise_separable_conv(x_nhwc, params, stride):
    """Forward of the PyTorch DepthwiseSeparableConv module (NHWC in/out)."""
    wdw, s1, b1, wpw, s2, b2 = params
    N, H, W, Cin = x_nhwc.shape
    Cout = wpw.shape[1]
    Ho = (H - 1) // stride + 1
    Wo = (W - 1) // stride + 1
    HoWo = Ho * Wo

    Cin_p = _round_up(Cin, LANE)
    Cout_p = _round_up(Cout, LANE)
    tco = _pick_cout_tile(Cout_p)
    n_co = Cout_p // tco

    # Fold BatchNorm scales into the conv weights (outside the kernel).
    wdw_f = jnp.pad(wdw * s1, ((0, 0), (0, Cin_p - Cin)))               # (9, Cin_p)
    b1_p = jnp.pad(b1, ((0, 0), (0, Cin_p - Cin)))                      # (1, Cin_p)
    wpw_f = jnp.pad(wpw * s2, ((0, Cin_p - Cin), (0, Cout_p - Cout)))
    wpw_f = wpw_f.astype(jnp.bfloat16)                                  # (Cin_p, Cout_p)
    b2_p = jnp.pad(b2, ((0, 0), (0, Cout_p - Cout)))                    # (1, Cout_p)

    # Spatial zero-pad (padding=1), channel pad to lane width, and parity
    # de-interleave so every depthwise tap read in-kernel is contiguous.
    x = jnp.pad(x_nhwc, ((0, 0), (1, 1), (1, 1), (0, Cin_p - Cin)))
    Hp, Wp = H + 2, W + 2
    Hh = _round_up(Hp, stride) // stride
    Wh = _round_up(Wp, stride) // stride
    x = jnp.pad(x, ((0, 0), (0, Hh * stride - Hp), (0, Wh * stride - Wp), (0, 0)))
    x = x.reshape(N, Hh, stride, Wh, stride, Cin_p)
    x = jnp.transpose(x, (0, 2, 1, 4, 3, 5))
    x = x.reshape(N, stride * Hh, stride * Wh, Cin_p)

    flops = 2 * N * HoWo * Cin_p * (9 + Cout_p)
    bytes_accessed = (x.size * 4 + wdw_f.size * 4 + b1_p.size * 4
                      + wpw_f.size * 2 + b2_p.size * 4 + N * HoWo * Cout_p * 4)

    out = pl.pallas_call(
        functools.partial(_dsconv_kernel, stride=stride, ho=Ho, wo=Wo),
        out_shape=jax.ShapeDtypeStruct((N, HoWo, Cout_p), x_nhwc.dtype),
        grid_spec=pltpu.PrefetchScalarGridSpec(
            num_scalar_prefetch=0,
            grid=(N, n_co),
            in_specs=[
                pl.BlockSpec((1, stride * Hh, stride * Wh, Cin_p),
                             lambda n, co: (n, 0, 0, 0)),
                pl.BlockSpec((9, Cin_p), lambda n, co: (0, 0)),
                pl.BlockSpec((1, Cin_p), lambda n, co: (0, 0)),
                pl.BlockSpec((Cin_p, tco), lambda n, co: (0, co)),
                pl.BlockSpec((1, tco), lambda n, co: (0, co)),
            ],
            out_specs=pl.BlockSpec((1, HoWo, tco), lambda n, co: (n, 0, co)),
            scratch_shapes=[pltpu.VMEM((HoWo, Cin_p), jnp.bfloat16)],
        ),
        compiler_params=pltpu.CompilerParams(
            dimension_semantics=("parallel", "arbitrary")),
        cost_estimate=pl.CostEstimate(flops=int(flops), transcendentals=0,
                                      bytes_accessed=int(bytes_accessed)),
    )(x, wdw_f, b1_p, wpw_f, b2_p)

    return out.reshape(N, Ho, Wo, Cout_p)[..., :Cout]


# ---------------------------------------------------------------------------
# Stem: ConvBNReLU(3, 32, kernel=3, stride=2, pad=1)
# ---------------------------------------------------------------------------
def _matmul_bias_relu6_kernel(x_ref, w_ref, b_ref, o_ref):
    out = jnp.dot(x_ref[0].astype(jnp.bfloat16), w_ref[...],
                  preferred_element_type=jnp.float32)
    o_ref[0] = jnp.clip(out + b_ref[...], 0.0, 6.0).astype(o_ref.dtype)


def conv_bn_relu6(x_nhwc, params, stride):
    """Standard 3x3 Conv + BN + ReLU6 (MobileNet stem), NHWC in/out.

    The 3x3 tap gather (im2col) for the 3-channel input is layout plumbing done
    in the wrapper; the Pallas kernel is the fused MXU matmul + bias + ReLU6.
    """
    w, scale, bias = params                    # (3,3,Cin,Cout), (1,Cout), (1,Cout)
    N, H, W, Cin = x_nhwc.shape
    Cout = w.shape[-1]
    Ho = (H - 1) // stride + 1
    Wo = (W - 1) // stride + 1
    HoWo = Ho * Wo

    K = 9 * Cin
    K_p = _round_up(K, LANE)
    Cout_p = _round_up(Cout, LANE)
    tco = _pick_cout_tile(Cout_p)
    n_co = Cout_p // tco

    xpad = jnp.pad(x_nhwc, ((0, 0), (1, 1), (1, 1), (0, 0)))
    taps = [xpad[:, ky:ky + (Ho - 1) * stride + 1:stride,
                 kx:kx + (Wo - 1) * stride + 1:stride, :]
            for ky in range(3) for kx in range(3)]
    x_im = jnp.concatenate(taps, axis=-1)                         # (N,Ho,Wo,9*Cin)
    x_im = jnp.pad(x_im, ((0, 0), (0, 0), (0, 0), (0, K_p - K)))
    x_im = x_im.reshape(N, HoWo, K_p)

    w_f = (w * scale.reshape(1, 1, 1, Cout)).reshape(K, Cout)
    w_f = jnp.pad(w_f, ((0, K_p - K), (0, Cout_p - Cout))).astype(jnp.bfloat16)
    b_f = jnp.pad(bias, ((0, 0), (0, Cout_p - Cout)))

    out = pl.pallas_call(
        _matmul_bias_relu6_kernel,
        out_shape=jax.ShapeDtypeStruct((N, HoWo, Cout_p), x_nhwc.dtype),
        grid_spec=pltpu.PrefetchScalarGridSpec(
            num_scalar_prefetch=0,
            grid=(N, n_co),
            in_specs=[
                pl.BlockSpec((1, HoWo, K_p), lambda n, co: (n, 0, 0)),
                pl.BlockSpec((K_p, tco), lambda n, co: (0, co)),
                pl.BlockSpec((1, tco), lambda n, co: (0, co)),
            ],
            out_specs=pl.BlockSpec((1, HoWo, tco), lambda n, co: (n, 0, co)),
        ),
        compiler_params=pltpu.CompilerParams(
            dimension_semantics=("parallel", "arbitrary")),
        cost_estimate=pl.CostEstimate(
            flops=int(2 * N * HoWo * K_p * Cout_p), transcendentals=0,
            bytes_accessed=int(x_im.size * 4 + w_f.size * 2
                               + N * HoWo * Cout_p * 4)),
    )(x_im, w_f, b_f)

    return out.reshape(N, Ho, Wo, Cout_p)[..., :Cout]


# ---------------------------------------------------------------------------
# Head: global average pool + Linear (fused)
# ---------------------------------------------------------------------------
def _avgpool_fc_kernel(x_ref, w_ref, b_ref, o_ref, *, inv_hw):
    pooled = jnp.sum(x_ref[0], axis=0, keepdims=True) * inv_hw       # (1, C_p)
    out = jnp.dot(pooled, w_ref[...], preferred_element_type=jnp.float32)
    o_ref[...] = (out + b_ref[...]).astype(o_ref.dtype)


def avgpool_fc(x_nhwc, w_fc, b_fc):
    N, H, W, C = x_nhwc.shape
    NC = w_fc.shape[1]
    C_p = _round_up(C, LANE)
    NC_p = _round_up(NC, LANE)
    tco = _pick_cout_tile(NC_p)
    n_co = NC_p // tco

    x = jnp.pad(x_nhwc, ((0, 0), (0, 0), (0, 0), (0, C_p - C)))
    x = x.reshape(N, H * W, C_p)
    w_p = jnp.pad(w_fc, ((0, C_p - C), (0, NC_p - NC)))
    b_p = jnp.pad(b_fc.reshape(1, NC), ((0, 0), (0, NC_p - NC)))

    out = pl.pallas_call(
        functools.partial(_avgpool_fc_kernel, inv_hw=1.0 / (H * W)),
        out_shape=jax.ShapeDtypeStruct((N, NC_p), jnp.float32),
        grid_spec=pltpu.PrefetchScalarGridSpec(
            num_scalar_prefetch=0,
            grid=(N, n_co),
            in_specs=[
                pl.BlockSpec((1, H * W, C_p), lambda n, co: (n, 0, 0)),
                pl.BlockSpec((C_p, tco), lambda n, co: (0, co)),
                pl.BlockSpec((1, tco), lambda n, co: (0, co)),
            ],
            out_specs=pl.BlockSpec((1, tco), lambda n, co: (n, co)),
        ),
        compiler_params=pltpu.CompilerParams(
            dimension_semantics=("parallel", "arbitrary")),
    )(x, w_p, b_p)

    return out[:, :NC]


# ---------------------------------------------------------------------------
# Full MobileNet forward (NCHW input, logits output — matches the PyTorch spec)
# ---------------------------------------------------------------------------
def mobilenet_forward(x_nchw, params):
    stem_p, block_ps, (w_fc, b_fc) = params
    x = jnp.transpose(x_nchw, (0, 2, 3, 1))            # NCHW -> NHWC, once
    x = conv_bn_relu6(x, stem_p, stride=2)
    feats = [x]
    for p, (_, _, stride) in zip(block_ps, MOBILENET_BLOCKS):
        x = depthwise_separable_conv(x, p, stride)
        feats.append(x)
    logits = avgpool_fc(x, w_fc, b_fc)
    return logits, feats


# ---------------------------------------------------------------------------
# Synthetic parameters (inference-mode BatchNorm fold) and pure-JAX reference
# ---------------------------------------------------------------------------
def _init_bn(key, c, eps=1e-5):
    kg, kb, km, kv = jax.random.split(key, 4)
    gamma = 1.0 + 0.1 * jax.random.normal(kg, (1, c), jnp.float32)
    beta = 0.1 * jax.random.normal(kb, (1, c), jnp.float32)
    mean = 0.1 * jax.random.normal(km, (1, c), jnp.float32)
    var = 0.5 + jnp.abs(jax.random.normal(kv, (1, c), jnp.float32))
    scale = gamma / jnp.sqrt(var + eps)
    bias = beta - mean * scale
    return scale, bias


def init_stem_params(key, cin, cout):
    kw, kbn = jax.random.split(key)
    w = jax.random.normal(kw, (3, 3, cin, cout), jnp.float32) / np.sqrt(9 * cin)
    s, b = _init_bn(kbn, cout)
    return w, s, b


def init_ds_params(key, cin, cout):
    k1, k2, k3, k4 = jax.random.split(key, 4)
    wdw = jax.random.normal(k1, (9, cin), jnp.float32) / 3.0
    s1, b1 = _init_bn(k2, cin)
    wpw = jax.random.normal(k3, (cin, cout), jnp.float32) / np.sqrt(cin)
    s2, b2 = _init_bn(k4, cout)
    return wdw, s1, b1, wpw, s2, b2


def init_mobilenet_params(key, num_classes=1000):
    ks = jax.random.split(key, len(MOBILENET_BLOCKS) + 3)
    stem = init_stem_params(ks[0], 3, 32)
    blocks = [init_ds_params(ks[i + 1], cin, cout)
              for i, (cin, cout, _) in enumerate(MOBILENET_BLOCKS)]
    w_fc = jax.random.normal(ks[-2], (1024, num_classes), jnp.float32) / np.sqrt(1024)
    b_fc = 0.1 * jax.random.normal(ks[-1], (num_classes,), jnp.float32)
    return stem, blocks, (w_fc, b_fc)


def ref_conv_bn_relu6(x_nhwc, params, stride):
    w, s, b = params
    cout = w.shape[-1]
    y = lax.conv_general_dilated(
        x_nhwc, w, (stride, stride), ((1, 1), (1, 1)),
        dimension_numbers=("NHWC", "HWIO", "NHWC"),
        precision=lax.Precision.HIGHEST)
    return jnp.clip(y * s.reshape(1, 1, 1, cout) + b.reshape(1, 1, 1, cout), 0.0, 6.0)


def ref_dsconv(x_nhwc, params, stride):
    wdw, s1, b1, wpw, s2, b2 = params
    cin, cout = wdw.shape[1], wpw.shape[1]
    dw = lax.conv_general_dilated(
        x_nhwc, wdw.reshape(3, 3, 1, cin), (stride, stride), ((1, 1), (1, 1)),
        dimension_numbers=("NHWC", "HWIO", "NHWC"),
        feature_group_count=cin, precision=lax.Precision.HIGHEST)
    dw = jnp.clip(dw * s1.reshape(1, 1, 1, cin) + b1.reshape(1, 1, 1, cin), 0.0, 6.0)
    pw = lax.conv_general_dilated(
        dw, wpw.reshape(1, 1, cin, cout), (1, 1), "VALID",
        dimension_numbers=("NHWC", "HWIO", "NHWC"),
        precision=lax.Precision.HIGHEST)
    return jnp.clip(pw * s2.reshape(1, 1, 1, cout) + b2.reshape(1, 1, 1, cout), 0.0, 6.0)


def ref_head(x_nhwc, w_fc, b_fc):
    pooled = jnp.mean(x_nhwc, axis=(1, 2))
    return jnp.dot(pooled, w_fc, precision=lax.Precision.HIGHEST) + b_fc


if __name__ == "__main__":
    key = jax.random.PRNGKey(0)
    k_x, k_p = jax.random.split(key)

    # Small spatial extent (32x32): the stem + four stride-2 blocks reduce it
    # to exactly 1x1 before the global average pool, matching the architecture.
    N, H, W = 2, 32, 32
    num_classes = 1000
    x = jax.random.normal(k_x, (N, 3, H, W), jnp.float32)
    params = init_mobilenet_params(k_p, num_classes)

    logits, feats = mobilenet_forward(x, params)
    logits = jax.block_until_ready(logits)
    assert logits.shape == (N, num_classes), logits.shape
    assert feats[-1].shape == (N, 1, 1, 1024), feats[-1].shape

    # Layer-wise validation: each reference layer is fed the Pallas output of
    # the previous layer, so every comparison stays at bf16-matmul error level.
    stem_p, block_ps, (w_fc, b_fc) = params
    x_nhwc = jnp.transpose(x, (0, 2, 3, 1))

    def check(name, got, want, atol=5e-2, rtol=5e-2):
        got, want = np.asarray(got), np.asarray(want)
        if not np.allclose(got, want, atol=atol, rtol=rtol):
            err = np.max(np.abs(got - want))
            raise AssertionError(f"{name}: Pallas kernel mismatch, max|diff|={err}")

    check("stem", feats[0], ref_conv_bn_relu6(x_nhwc, stem_p, 2))
    prev = feats[0]
    for i, (p, (_, _, stride)) in enumerate(zip(block_ps, MOBILENET_BLOCKS)):
        check(f"block{i + 1}", feats[i + 1], ref_dsconv(prev, p, stride))
        prev = feats[i + 1]
    check("head", logits, ref_head(prev, w_fc, b_fc))

    print("KERNEL_OK")
</pallas_src>

<mosaic_0001>
module attributes {stable_mosaic.version = 11 : i64} {
  func.func @_matmul_bias_relu6_kernel(%arg0: i32, %arg1: i32, %arg2: memref<1x256x128xf32, #tpu.memory_space<vmem>>, %arg3: memref<128x128xbf16, #tpu.memory_space<vmem>>, %arg4: memref<1x128xf32, #tpu.memory_space<vmem>>, %arg5: memref<1x256x128xf32, #tpu.memory_space<vmem>>) attributes {dimension_semantics = [#tpu.dimension_semantics<parallel>, #tpu.dimension_semantics<arbitrary>], iteration_bounds = array<i64: 2, 1>, scalar_prefetch = 0 : i64, scratch_operands = 0 : i64, tpu.core_type = #tpu.core_type<tc>, window_params = [{transform_indices = @transform_0, window_bounds = array<i64: 1, 256, 128>}, {transform_indices = @transform_1, window_bounds = array<i64: 128, 128>}, {transform_indices = @transform_2, window_bounds = array<i64: 1, 128>}, {transform_indices = @transform_3, window_bounds = array<i64: 1, 256, 128>}]} {
    %c0 = arith.constant 0 : index
    %c0_0 = arith.constant 0 : index
    %c0_1 = arith.constant 0 : index
    %0 = vector.load %arg2[%c0, %c0_0, %c0_1] : memref<1x256x128xf32, #tpu.memory_space<vmem>>, vector<1x256x128xf32>
    %1 = vector.shape_cast %0 : vector<1x256x128xf32> to vector<256x128xf32>
    %2 = arith.truncf %1 : vector<256x128xf32> to vector<256x128xbf16>
    %c0_2 = arith.constant 0 : index
    %c0_3 = arith.constant 0 : index
    %3 = vector.load %arg3[%c0_2, %c0_3] : memref<128x128xbf16, #tpu.memory_space<vmem>>, vector<128x128xbf16>
    %cst = arith.constant dense<0.000000e+00> : vector<256x128xf32>
    %4 = tpu.matmul %2, %3, %cst {dimension_numbers = #tpu.dot_dimension_numbers<[1], [0], [0], [1], [0, 0, 1, 1], [], []>} : vector<256x128xbf16>, vector<128x128xbf16>, vector<256x128xf32> -> vector<256x128xf32>
    %c0_4 = arith.constant 0 : index
    %c0_5 = arith.constant 0 : index
    %5 = vector.load %arg4[%c0_4, %c0_5] : memref<1x128xf32, #tpu.memory_space<vmem>>, vector<1x128xf32>
    %6 = vector.broadcast %5 : vector<1x128xf32> to vector<256x128xf32>
    %7 = arith.addf %4, %6 : vector<256x128xf32>
    %cst_6 = arith.constant 0.000000e+00 : f32
    %cst_7 = arith.constant 6.000000e+00 : f32
    %8 = vector.broadcast %cst_6 : f32 to vector<256x128xf32>
    %9 = arith.maximumf %8, %7 : vector<256x128xf32>
    %10 = vector.broadcast %cst_7 : f32 to vector<256x128xf32>
    %11 = arith.minimumf %10, %9 : vector<256x128xf32>
    %c0_8 = arith.constant 0 : index
    %c0_9 = arith.constant 0 : index
    %c0_10 = arith.constant 0 : index
    %12 = vector.load %arg5[%c0_8, %c0_9, %c0_10] : memref<1x256x128xf32, #tpu.memory_space<vmem>>, vector<1x256x128xf32>
    %13 = vector.shape_cast %12 : vector<1x256x128xf32> to vector<256x128xf32>
    %14 = vector.shape_cast %11 : vector<256x128xf32> to vector<1x256x128xf32>
    tpu.vector_store %arg5[%c0_8, %c0_9, %c0_10], %14 {strides = array<i32>} : memref<1x256x128xf32, #tpu.memory_space<vmem>>, vector<1x256x128xf32>,
    return
  }
  func.func @transform_0(%arg0: i32, %arg1: i32) -> (i32, i32, i32) {
    %c0_i32 = arith.constant 0 : i32
    %c0_i32_0 = arith.constant 0 : i32
    %c0_i32_1 = arith.constant 0 : i32
    return %arg0, %c0_i32, %c0_i32_0 : i32, i32, i32
  }
  func.func @transform_1(%arg0: i32, %arg1: i32) -> (i32, i32) {
    %c0_i32 = arith.constant 0 : i32
    %c0_i32_0 = arith.constant 0 : i32
    return %c0_i32, %arg1 : i32, i32
  }
  func.func @transform_2(%arg0: i32, %arg1: i32) -> (i32, i32) {
    %c0_i32 = arith.constant 0 : i32
    %c0_i32_0 = arith.constant 0 : i32
    return %c0_i32, %arg1 : i32, i32
  }
  func.func @transform_3(%arg0: i32, %arg1: i32) -> (i32, i32, i32) {
    %c0_i32 = arith.constant 0 : i32
    %c0_i32_0 = arith.constant 0 : i32
    return %arg0, %c0_i32, %arg1 : i32, i32, i32
  }
}

</mosaic_0001>

<bundles_post_ra>
// kernel: tpu_custom_call.1
= control target key start
LH: loop header
LB: loop body
LE: loop exit
PB: predicated region body
PF: predicated region fallthrough
CT: control target
= control target key end

     0   :  { %8 = vsyncpa [#allocation3], 0  ;;  %s1446_s0 = inlined_call_operand.hbm [shape: f32[2,256,128], index: 0, kind: input, shape index: {}]   ;;  %s1447_s1 = inlined_call_operand.hbm [shape: bf16[128,128], index: 1, kind: input, shape index: {}]   ;;  %s1448_s2 = inlined_call_operand.vmem [shape: f32[1,128], index: 2, kind: input, shape index: {}]   ;;  %s1449_s3 = inlined_call_operand.hbm [shape: f32[2,256,128], index: 3, kind: output, shape index: {}]  }
   0x1   :  { %10 = vsyncpa [#allocation3 + $0x1], 0 }
   0x2   :  { %11 = vsyncpa [#allocation6], 0 }
   0x3   :  { %12 = vsyncpa [#allocation4], 0 }
   0x4   :  { %14 = vsyncpa [#allocation4 + $0x1], 0  ;;  %s1117_s12 = smov 0   ;;  %s1119_s13 = smov 0  }
   0x5   :  { %s1121_s14 = smov 0   ;;  %s1123_s15 = smov 0  }
   0x6   :  { %s1125_s16 = smov 0   ;;  %s1127_s17 = smov 0  }
   0x7 LB: > { %s738_s18 = sadd.s32 4294967295, %s1086_s17   ;;  %s739_s19 = sadd.s32 4294967294, %s1086_s17   ;;  %s1086_s17 = sphi %s1127_s17, %s20_s17   ;;  %s1082_s16 = sphi %s1125_s16, %s1473_s16   ;;  %s1078_s15 = sphi %s1123_s15, %s1472_s15   ;;  %s1074_s14 = sphi %s1121_s14, %s1471_s14   ;;  %s1070_s13 = sphi %s1119_s13, %s1470_s13   ;;  %s1066_s12 = sphi %s1117_s12, %s1469_s12  }
   0x8   : > { %p52_p0 = scmp.ne.s32.totalorder %s1070_s13, %s1066_s12  ;;  %p1151_p1 = scmp.eq.s32.totalorder %s738_s18, 0 }
   0x9   : > { %p1155_p2 = scmp.eq.s32.totalorder %s738_s18, 1  ;;  %p136_p3 = scmp.eq.s32.totalorder %s739_s19, 1 }
   0xa   : > { %s1454_s20 = scalar_select %p1151_p1, 1, 0 }
   0xb   : > { %s1455_s21 = scalar_select %p1155_p2, 1, 0 }
   0xc   : > { %p1161_p4 = por %p1151_p1, %p52_p0  ;;  %p740_p5 = scmp.ge.s32.totalorder %s1086_s17, 1 }
   0xd   : > { %p1166_p6 = por %p136_p3, %p52_p0  ;;  %p143_p7 = scmp.lt.s32.totalorder %s1086_s17, 3 }
   0xe   : > { %s1456_s22 = scalar_select %p1161_p4, 1, 0 }
   0xf   : > { %s1457_s23 = scalar_select %p1166_p6, 1, 0 }
  0x10   : > { %p1171_p8 = pnand %p740_p5, %p143_p7  ;;  %s1088_s25 = smov [#allocation5]  }
  0x11   : > { %s157_s26 = sshll.u32 %s1088_s25, 4  ;;  %s32_s28 = sadd.s32 1, %s1082_s16  ;;  %s158_s26 = int_to_ptr.vmem [resolvable:$true] %s157_s26 }
  0x12   : > { %s1458_s24 = scalar_select %p1171_p8, 1, 0 }
  0x13   : > { %p863_p9 = pneg %p1171_p8  ;;  %s942_s4 = scalar_lea.hbm %s1447_s1, 1024 }
  0x14   : > { %p943_p12 = scmp.ne.s32.totalorder %s1447_s1, %s942_s4  ;;  %p949_p5 = scmp.lt.u32.totalorder %s942_s4, %s1447_s1 }
  0x15   : > { %p1180_p11 = pnand %p863_p9, %p1151_p1 }
  0x17   : > { %p944_p13 = pneg %p1180_p11 }
  0x19   : > { %p945_p0 = pnand %p944_p13, %p943_p12 }
  0x1b   : > { %p946_p3 = pneg %p945_p0 }
  0x1d   : > { %p951_p7 = pnand %p949_p5, %p946_p3 }
  0x1f   : > { %954 = shalt.err (!%p951_p7)
}
  0x20   : > { %s955_s9 = scalar_lea.vmem %s158_s26, 1024  ;;  %p963_p1 = scmp.lt.s32.totalorder %s158_s26, %s158_s26 }
  0x21   : > { %p956_p9 = scmp.ne.s32.totalorder %s158_s26, %s955_s9  ;;  %p964_p4 = scmp.lt.s32.totalorder %s955_s9, %s955_s9 }
  0x23   : > { %p958_p10 = pnand %p956_p9, %p944_p13  ;;  %p965_p8 = por %p964_p4, %p963_p1 }
  0x25   : > { %p959_p6 = pneg %p958_p10 }
  0x27   : > { %p966_p2 = pnand %p965_p8, %p959_p6 }
  0x29   : > { %969 = shalt.err (!%p966_p2)
}
  0x2a   : > { %s1089_s10 = smov 64   ;;  %s1090_s11 = smov 4  }
  0x2b   : > { %866 = dma.hbm_to_vmem [thread:$0]  (!%p1180_p11), %s1447_s1, 1024, %s158_s26, [#allocation6], %s1089_s10, %s1089_s10, %s1090_s11  }
  0x2c   : > { %p34_p1 = scmp.ge.s32.totalorder %s32_s28, 2  ;;  %s39_s25 = sadd.s32 1, %s1074_s14 }
  0x2d   : > { %p46_p2 = scmp.ne.s32.totalorder %s1074_s14, %s1070_s13  ;;  %p47_p4 = scmp.eq.s32.totalorder %s1086_s17, 0 }
  0x2e   : > { %s1475_s28 = smov (%p34_p1, %s32_s28), 0  ;;  %p1461_p8 = scmp.ne.s32.totalorder %s1455_s21, 0 }
  0x2f   : > { %p1207_p6 = por %p47_p4, %p46_p2  ;;  %s36_s27 = ssub.s32 %s1082_s16, %s1475_s28 }
  0x30   : > { %p1213_p10 = por %p1461_p8, %p46_p2  ;;  %p876_p12 = scmp.lt.s32.totalorder %s1086_s17, 2 }
  0x31   : > { %p37_p11 = scmp.eq.s32.totalorder %s36_s27, 0  ;;  %s177_s26 = sand.u32 1, %s1074_s14  }
  0x32   : > { %s744_s4 = sshll.u32 %s177_s26, 8  ;;  %s765_s6 = sshll.u32 %s1082_s16, 12 }
  0x33   : > { %s1222_s5 = scalar_select %p37_p11, %s1074_s14, %s39_s25  }
  0x34   : > { %s1228_s9 = scalar_lea.hbm %s1446_s0, %s765_s6  ;;  %s181_s21 = scalar_lea.vmem [#allocation2], %s744_s4 }
  0x35   : > { %s188_s10 = sshll.u32 %s181_s21, 4  ;;  %p1234_p13 = pnand %p876_p12, %p1207_p6  ;;  %s1230_s10 = int_to_ptr.vmem [resolvable:$true] %s188_s10 }
  0x36   : > { %s1238_s18 = scalar_lea.sflag [#allocation3], %s177_s26  ;;  %s970_s19 = scalar_lea.hbm %s1228_s9, 4096 }
  0x37   : > { %p971_p0 = scmp.ne.s32.totalorder %s1228_s9, %s970_s19  ;;  %p972_p3 = pneg %p1234_p13 }
  0x38   : > { %s975_s29 = scalar_lea.hbm %s1446_s0, 8192  ;;  %p976_p9 = scmp.lt.u32.totalorder %s1228_s9, %s1446_s0 }
  0x39   : > { %p973_p5 = pnand %p972_p3, %p971_p0  ;;  %p977_p1 = scmp.lt.u32.totalorder %s975_s29, %s970_s19 }
  0x3a   : > { %p979_p4 = scmp.lt.u32.totalorder %s970_s19, %s1228_s9 }
  0x3b   : > { %p974_p7 = pneg %p973_p5  ;;  %p978_p2 = por %p977_p1, %p976_p9 }
  0x3d   : > { %p980_p6 = por %p979_p4, %p978_p2 }
  0x3f   : > { %p981_p8 = pnand %p980_p6, %p974_p7 }
  0x41   : > { %984 = shalt.err (!%p981_p8)
}
  0x42   : > { %s985_s26 = scalar_lea.vmem %s1230_s10, 4096  ;;  %s1091_s7 = smov [#allocation2]  }
  0x43   : > { %p986_p12 = scmp.ne.s32.totalorder %s1230_s10, %s985_s26  ;;  %s990_s8 = sshll.u32 %s1091_s7, 4  ;;  %s991_s8 = int_to_ptr.vmem [resolvable:$false] %s990_s8 }
  0x44   : > { %s992_s21 = scalar_lea.vmem %s991_s8, 8192  ;;  %p993_p5 = scmp.lt.s32.totalorder %s1230_s10, %s991_s8 }
  0x45   : > { %p988_p11 = pnand %p986_p12, %p972_p3  ;;  %p994_p9 = scmp.lt.s32.totalorder %s992_s21, %s985_s26 }
  0x47   : > { %p989_p0 = pneg %p988_p11  ;;  %p995_p1 = por %p994_p9, %p993_p5 }
  0x49   : > { %p996_p2 = pnand %p995_p1, %p989_p0 }
  0x4b   : > { %999 = shalt.err (!%p996_p2)
}
  0x4c   : > { %s1092_s19 = smov 128   ;;  %s1093_s25 = smov 8  }
  0x4d   : > { %870 = dma.hbm_to_vmem [thread:$0]  (!%p1234_p13), %s1228_s9, 4096, %s1230_s10, %s1238_s18, %s1092_s19, %s1092_s19, %s1093_s25  }
  0x4e   : > { %p1464_p3 = scmp.ne.s32.totalorder %s1458_s24, 0 }
  0x4f   : > { %s1269_s27 = sand.u32 (!%p1464_p3), 1, %s1070_s13   ;;  %p1465_p7 = scmp.ne.s32.totalorder (!%p1464_p3), %s1456_s22, 0 }
  0x50   : > { %200 = sbr.rel (%p1464_p3) target bundleno = 384 (0x180), region = 32  ;;  %s748_s29 = sshll.u32 (!%p1464_p3), %s1269_s27, 8 }
  0x51   : > { %s203_s4 = scalar_lea.sflag (!%p1464_p3), [#allocation3], %s1269_s27  ;;  %s1275_s6 = scalar_lea.vmem (!%p1464_p3), [#allocation2], %s748_s29 }
  0x57   : > { %1053 = dma.done.wait (%p1465_p7), %s203_s4, 4096  }
  0x58   : > { %1055 = vsyncadd (%p1465_p7), %s203_s4, 4294963200  ;;  %p1466_p13 = scmp.ne.s32.totalorder %s1454_s20, 0 }
  0x5a   : > { %1057 = dma.done.wait (%p1466_p13), [#allocation6], 1024  }
  0x5b   : > { %1059 = vsyncadd (%p1466_p13), [#allocation6], 4294966272  ;;  %v934_v0 = vld [vmem:[#allocation5] sm:$0xff]   ;;  %v935_v1 = vld [vmem:[#allocation5 + $0x8] sm:$0xff]   ;;  %s1332_s24 = scalar_lea.vmem [#allocation7], %s748_s29  ;;  %s766_s9 = sshll.u32 %s1078_s15, 12 }
  0x5c   : > { %791 = vmatprep.subr.bf16.mxu0 %v934_v0  ;;  %839 = vmatprep.subr.bf16.mxu1 %v934_v0  ;;  %v936_v2 = vld [vmem:[#allocation5 + $0x10] sm:$0xff]   ;;  %v937_v3 = vld [vmem:[#allocation5 + $0x18] sm:$0xff]   ;;  %v240_v4 = vld [vmem:[%s1275_s6] sm:$0xff]  ;;  %s631_s10 = sshll.u32 %s1332_s24, 4  ;;  %s1389_s18 = scalar_lea.hbm %s1449_s3, %s766_s9  ;;  %s1391_s10 = int_to_ptr.vmem [resolvable:$true] %s631_s10 }
  0x5d   : > { %792 = vmatpush3.bf16.msra.mxu0 %v934_v0  ;;  %847 = vmatpush3.bf16.msra.mxu1 %v934_v0  ;;  %v241_v5 = vld [vmem:[%s1275_s6 + $0x8] sm:$0xff]  ;;  %v256_v6 = vld [vmem:[%s1275_s6 + $0x80] sm:$0xff]  ;;  %v940_v12 = vld [vmem:[#allocation5 + $0x30] sm:$0xff]   ;;  %s617_s26 = scalar_lea.sflag [#allocation4], %s1269_s27  ;;  %s1000_s7 = scalar_lea.vmem %s1391_s10, 4096 }
  0x5e   : > { %793 = vmatprep.subr.bf16.mxu0 %v935_v1  ;;  %840 = vmatprep.subr.bf16.mxu1 %v935_v1  ;;  %v272_v7 = vpack.c.bf16 %v241_v5, %v240_v4  ;;  %v257_v8 = vld [vmem:[%s1275_s6 + $0x88] sm:$0xff]  ;;  %v938_v10 = vld [vmem:[#allocation5 + $0x20] sm:$0xff]   ;;  %v941_v13 = vld [vmem:[#allocation5 + $0x38] sm:$0xff]   ;;  %p1001_p4 = scmp.ne.s32.totalorder %s1391_s10, %s1000_s7  ;;  %s1094_s8 = smov [#allocation7]  }
  0x5f   : > { %v280_v9 = vpack.c.bf16 %v257_v8, %v256_v6  ;;  %v939_v11 = vld [vmem:[#allocation5 + $0x28] sm:$0xff]   ;;  %v242_v14 = vld [vmem:[%s1275_s6 + $0x10] sm:$0xff]  ;;  %v243_v15 = vld [vmem:[%s1275_s6 + $0x18] sm:$0xff]  ;;  %s1004_s21 = sshll.u32 %s1094_s8, 4  ;;  %s1005_s21 = int_to_ptr.vmem [resolvable:$false] %s1004_s21 }
  0x60   : > { %807 = vmatprep.mubr.bf16.mxu0 %v272_v7  ;;  %v258_v16 = vld [vmem:[%s1275_s6 + $0x90] sm:$0xff]  ;;  %v259_v17 = vld [vmem:[%s1275_s6 + $0x98] sm:$0xff]  ;;  %v244_v18 = vld [vmem:[%s1275_s6 + $0x20] sm:$0xff]  ;;  %v273_v22 = vpack.c.bf16 %v243_v15, %v242_v14  ;;  %p1002_p6 = pnand %p1001_p4, %p1213_p10  ;;  %s1006_s19 = scalar_lea.vmem %s1005_s21, 8192 }
  0x61   : > { %794 = vmatpush3.bf16.msra.mxu0 %v935_v1  ;;  %848 = vmatpush3.bf16.msra.mxu1 %v935_v1  ;;  %v245_v19 = vld [vmem:[%s1275_s6 + $0x28] sm:$0xff]  ;;  %v260_v20 = vld [vmem:[%s1275_s6 + $0xa0] sm:$0xff]  ;;  %v281_v23 = vpack.c.bf16 %v259_v17, %v258_v16  ;;  %v246_v26 = vld [vmem:[%s1275_s6 + $0x30] sm:$0xff]  ;;  %p1007_p12 = scmp.lt.s32.totalorder %s1391_s10, %s1005_s21  ;;  %p1008_p11 = scmp.lt.s32.totalorder %s1006_s19, %s1000_s7 }
  0x62   : > { %795 = vmatprep.subr.bf16.mxu0 %v936_v2  ;;  %841 = vmatprep.subr.bf16.mxu1 %v936_v2  ;;  %v261_v21 = vld [vmem:[%s1275_s6 + $0xa8] sm:$0xff]  ;;  %v274_v24 = vpack.c.bf16 %v245_v19, %v244_v18  ;;  %v247_v27 = vld [vmem:[%s1275_s6 + $0x38] sm:$0xff]  ;;  %v262_v28 = vld [vmem:[%s1275_s6 + $0xb0] sm:$0xff]  ;;  %p1003_p8 = pneg %p1002_p6 }
  0x63   : > { %823 = vmatprep.mubr.bf16.mxu1 %v280_v9  ;;  %v282_v25 = vpack.c.bf16 %v261_v21, %v260_v20  ;;  %v263_v29 = vld [vmem:[%s1275_s6 + $0xb8] sm:$0xff]  ;;  %v248_v30 = vld [vmem:[%s1275_s6 + $0x40] sm:$0xff]  ;;  %v249_v31 = vld [vmem:[%s1275_s6 + $0x48] sm:$0xff]  ;;  %v275_v34 = vpack.c.bf16 %v247_v27, %v246_v26  ;;  %p1009_p0 = por %p1008_p11, %p1007_p12 }
  0x64   : > { %v264_v32 = vld [vmem:[%s1275_s6 + $0xc0] sm:$0xff]  ;;  %v265_v33 = vld [vmem:[%s1275_s6 + $0xc8] sm:$0xff]  ;;  %v283_v35 = vpack.c.bf16 %v263_v29, %v262_v28  ;;  %v276_v36 = vpack.c.bf16 %v249_v31, %v248_v30  ;;  %v250_v38 = vld [vmem:[%s1275_s6 + $0x50] sm:$0xff] }
  0x65   : > { %796 = vmatpush3.bf16.msra.mxu0 %v936_v2  ;;  %849 = vmatpush3.bf16.msra.mxu1 %v936_v2  ;;  %v284_v37 = vpack.c.bf16 %v265_v33, %v264_v32  ;;  %v251_v39 = vld [vmem:[%s1275_s6 + $0x58] sm:$0xff]  ;;  %v266_v40 = vld [vmem:[%s1275_s6 + $0xd0] sm:$0xff]  ;;  %v252_v42 = vld [vmem:[%s1275_s6 + $0x60] sm:$0xff]  ;;  %p1010_p5 = pnand %p1009_p0, %p1003_p8 }
  0x66   : > { %797 = vmatprep.subr.bf16.mxu0 %v937_v3  ;;  %842 = vmatprep.subr.bf16.mxu1 %v937_v3  ;;  %v267_v41 = vld [vmem:[%s1275_s6 + $0xd8] sm:$0xff]  ;;  %v253_v43 = vld [vmem:[%s1275_s6 + $0x68] sm:$0xff]  ;;  %v268_v44 = vld [vmem:[%s1275_s6 + $0xe0] sm:$0xff]  ;;  %v277_v46 = vpack.c.bf16 %v251_v39, %v250_v38 }
  0x67   : > { %v269_v45 = vld [vmem:[%s1275_s6 + $0xe8] sm:$0xff]  ;;  %v285_v47 = vpack.c.bf16 %v267_v41, %v266_v40  ;;  %v278_v48 = vpack.c.bf16 %v253_v43, %v252_v42  ;;  %v254_v50 = vld [vmem:[%s1275_s6 + $0x70] sm:$0xff]  ;;  %v255_v51 = vld [vmem:[%s1275_s6 + $0x78] sm:$0xff] }
  0x68   : > { %v286_v49 = vpack.c.bf16 %v269_v45, %v268_v44  ;;  %v270_v52 = vld [vmem:[%s1275_s6 + $0xf0] sm:$0xff]  ;;  %v271_v53 = vld [vmem:[%s1275_s6 + $0xf8] sm:$0xff]  ;;  %v279_v54 = vpack.c.bf16 %v255_v51, %v254_v50  ;;  %v1320_v56 = vld [vmem:[%s1448_s2] ss:$0 sm:$0xff] }
  0x69   : > { %798 = vmatpush3.bf16.msra.mxu0 %v937_v3  ;;  %850 = vmatpush3.bf16.msra.mxu1 %v937_v3  ;;  %v287_v55 = vpack.c.bf16 %v271_v53, %v270_v52 }
  0x6a   : > { %799 = vmatprep.subr.bf16.mxu0 %v938_v10  ;;  %843 = vmatprep.subr.bf16.mxu1 %v938_v10 }
  0x6d   : > { %800 = vmatpush3.bf16.msra.mxu0 %v938_v10  ;;  %851 = vmatpush3.bf16.msra.mxu1 %v938_v10 }
  0x6e   : > { %801 = vmatprep.subr.bf16.mxu0 %v939_v11  ;;  %844 = vmatprep.subr.bf16.mxu1 %v939_v11 }
  0x71   : > { %802 = vmatpush3.bf16.msra.mxu0 %v939_v11  ;;  %852 = vmatpush3.bf16.msra.mxu1 %v939_v11 }
  0x72   : > { %803 = vmatprep.subr.bf16.mxu0 %v940_v12  ;;  %845 = vmatprep.subr.bf16.mxu1 %v940_v12 }
  0x75   : > { %804 = vmatpush3.bf16.msra.mxu0 %v940_v12  ;;  %853 = vmatpush3.bf16.msra.mxu1 %v940_v12 }
  0x76   : > { %805 = vmatprep.subr.bf16.mxu0 %v941_v13  ;;  %846 = vmatprep.subr.bf16.mxu1 %v941_v13 }
  0x79   : > { %806 = vmatpush3.bf16.msra.mxu0 %v941_v13  ;;  %854 = vmatpush3.bf16.msra.mxu1 %v941_v13 }
  0x7c   : > { %808 = vmatmul.mubr.bf16.vlgmr.msra.gmra.mrb[0].mxu0 %v273_v22  ;;  %824 = vmatmul.mubr.bf16.vlgmr.msra.gmra.mrb[0].mxu1 %v281_v23 }
  0x7d   : > { %811 = vmatprep.mubr.bf16.mxu0 %v274_v24  ;;  %827 = vmatprep.mubr.bf16.mxu1 %v282_v25 }
  0x84   : > { %812 = vmatmul.mubr.bf16.gmra.mrb[4].mxu0 %v275_v34  ;;  %828 = vmatmul.mubr.bf16.gmra.mrb[4].mxu1 %v283_v35 }
  0x85   : > { %815 = vmatprep.mubr.bf16.mxu0 %v276_v36  ;;  %831 = vmatprep.mubr.bf16.mxu1 %v284_v37 }
  0x8c   : > { %816 = vmatmul.mubr.bf16.gmra.mrb[8].mxu0 %v277_v46  ;;  %832 = vmatmul.mubr.bf16.gmra.mrb[8].mxu1 %v285_v47 }
  0x8d   : > { %819 = vmatprep.mubr.bf16.mxu0 %v278_v48  ;;  %835 = vmatprep.mubr.bf16.mxu1 %v286_v49 }
  0x94   : > { %820 = vmatmul.mubr.bf16.gmra.mrb[12].mxu0 %v279_v54  ;;  %836 = vmatmul.mubr.bf16.gmra.mrb[12].mxu1 %v287_v55 }
 0x14f   : > { %v809_v57 = vpop.f32.mrb[0].mxu0  ;;  %v825_v58 = vpop.f32.mrb[0].mxu1 }
 0x150   : > { %v402_v59 = vadd.f32 %v809_v57, %v1320_v56  ;;  %v466_v60 = vadd.f32 %v825_v58, %v1320_v56  ;;  %v393_v61 = vpop.f32.mrb[1].mxu0  ;;  %v457_v62 = vpop.f32.mrb[1].mxu1 }
 0x151   : > { %v394_v63 = vadd.f32 %v1320_v56, %v393_v61  ;;  %v458_v0 = vadd.f32 %v1320_v56, %v457_v62  ;;  %v810_v1 = vpop.f32.mrb[2].mxu0  ;;  %v826_v2 = vpop.f32.mrb[2].mxu1 }
 0x152   : > { %v522_v3 = vmax.f32 %v402_v59, 0.0  ;;  %v538_v4 = vmax.f32 %v466_v60, 0.0  ;;  %v405_v5 = vadd.f32 %v810_v1, %v1320_v56  ;;  %v469_v6 = vadd.f32 %v826_v2, %v1320_v56  ;;  %v396_v7 = vpop.f32.mrb[3].mxu0  ;;  %v460_v8 = vpop.f32.mrb[3].mxu1 }
 0x153   : > { %v520_v9 = vmax.f32 %v394_v63, 0.0  ;;  %v536_v10 = vmax.f32 %v458_v0, 0.0  ;;  %v397_v11 = vadd.f32 %v1320_v56, %v396_v7  ;;  %v461_v12 = vadd.f32 %v1320_v56, %v460_v8 }
 0x154   : > { %v554_v13 = vmin.f32 %v522_v3, 6.0  ;;  %v570_v14 = vmin.f32 %v538_v4, 6.0  ;;  %v523_v15 = vmax.f32 %v405_v5, 0.0  ;;  %v539_v16 = vmax.f32 %v469_v6, 0.0 }
 0x155   : > { %v552_v17 = vmin.f32 %v520_v9, 6.0  ;;  %v568_v18 = vmin.f32 %v536_v10, 6.0  ;;  %v521_v19 = vmax.f32 %v397_v11, 0.0  ;;  %v537_v20 = vmax.f32 %v461_v12, 0.0 }
 0x156   : > { %586 = vst [vmem:[%s1332_s24 + $0x10] sm:$0xff] %v554_v13  ;;  %602 = vst [vmem:[%s1332_s24 + $0x90] sm:$0xff] %v570_v14  ;;  %v555_v21 = vmin.f32 %v523_v15, 6.0  ;;  %v571_v22 = vmin.f32 %v539_v16, 6.0 }
 0x157   : > { %584 = vst [vmem:[%s1332_s24] sm:$0xff] %v552_v17  ;;  %600 = vst [vmem:[%s1332_s24 + $0x80] sm:$0xff] %v568_v18  ;;  %v553_v23 = vmin.f32 %v521_v19, 6.0  ;;  %v569_v24 = vmin.f32 %v537_v20, 6.0  ;;  %v813_v25 = vpop.f32.mrb[4].mxu0  ;;  %v829_v26 = vpop.f32.mrb[4].mxu1 }
 0x158   : > { %587 = vst [vmem:[%s1332_s24 + $0x18] sm:$0xff] %v555_v21  ;;  %603 = vst [vmem:[%s1332_s24 + $0x98] sm:$0xff] %v571_v22  ;;  %v418_v27 = vadd.f32 %v813_v25, %v1320_v56  ;;  %v482_v28 = vadd.f32 %v829_v26, %v1320_v56  ;;  %v409_v29 = vpop.f32.mrb[5].mxu0  ;;  %v473_v30 = vpop.f32.mrb[5].mxu1 }
 0x159   : > { %585 = vst [vmem:[%s1332_s24 + $0x8] sm:$0xff] %v553_v23  ;;  %601 = vst [vmem:[%s1332_s24 + $0x88] sm:$0xff] %v569_v24  ;;  %v410_v31 = vadd.f32 %v1320_v56, %v409_v29  ;;  %v474_v32 = vadd.f32 %v1320_v56, %v473_v30  ;;  %v814_v33 = vpop.f32.mrb[6].mxu0  ;;  %v830_v34 = vpop.f32.mrb[6].mxu1 }
 0x15a   : > { %v526_v35 = vmax.f32 %v418_v27, 0.0  ;;  %v542_v36 = vmax.f32 %v482_v28, 0.0  ;;  %v421_v37 = vadd.f32 %v814_v33, %v1320_v56  ;;  %v485_v38 = vadd.f32 %v830_v34, %v1320_v56  ;;  %v412_v39 = vpop.f32.mrb[7].mxu0  ;;  %v476_v40 = vpop.f32.mrb[7].mxu1 }
 0x15b   : > { %v524_v41 = vmax.f32 %v410_v31, 0.0  ;;  %v540_v42 = vmax.f32 %v474_v32, 0.0  ;;  %v413_v43 = vadd.f32 %v1320_v56, %v412_v39  ;;  %v477_v44 = vadd.f32 %v1320_v56, %v476_v40 }
 0x15c   : > { %v558_v45 = vmin.f32 %v526_v35, 6.0  ;;  %v574_v46 = vmin.f32 %v542_v36, 6.0  ;;  %v527_v47 = vmax.f32 %v421_v37, 0.0  ;;  %v543_v48 = vmax.f32 %v485_v38, 0.0 }
 0x15d   : > { %v556_v49 = vmin.f32 %v524_v41, 6.0  ;;  %v572_v50 = vmin.f32 %v540_v42, 6.0  ;;  %v525_v51 = vmax.f32 %v413_v43, 0.0  ;;  %v541_v52 = vmax.f32 %v477_v44, 0.0 }
 0x15e   : > { %590 = vst [vmem:[%s1332_s24 + $0x30] sm:$0xff] %v558_v45  ;;  %606 = vst [vmem:[%s1332_s24 + $0xb0] sm:$0xff] %v574_v46  ;;  %v559_v53 = vmin.f32 %v527_v47, 6.0  ;;  %v575_v54 = vmin.f32 %v543_v48, 6.0 }
 0x15f   : > { %588 = vst [vmem:[%s1332_s24 + $0x20] sm:$0xff] %v556_v49  ;;  %604 = vst [vmem:[%s1332_s24 + $0xa0] sm:$0xff] %v572_v50  ;;  %v557_v55 = vmin.f32 %v525_v51, 6.0  ;;  %v573_v57 = vmin.f32 %v541_v52, 6.0  ;;  %v817_v58 = vpop.f32.mrb[8].mxu0  ;;  %v833_v59 = vpop.f32.mrb[8].mxu1 }
 0x160   : > { %591 = vst [vmem:[%s1332_s24 + $0x38] sm:$0xff] %v559_v53  ;;  %607 = vst [vmem:[%s1332_s24 + $0xb8] sm:$0xff] %v575_v54  ;;  %v434_v60 = vadd.f32 %v817_v58, %v1320_v56  ;;  %v498_v61 = vadd.f32 %v833_v59, %v1320_v56  ;;  %v425_v62 = vpop.f32.mrb[9].mxu0  ;;  %v489_v63 = vpop.f32.mrb[9].mxu1 }
 0x161   : > { %589 = vst [vmem:[%s1332_s24 + $0x28] sm:$0xff] %v557_v55  ;;  %605 = vst [vmem:[%s1332_s24 + $0xa8] sm:$0xff] %v573_v57  ;;  %v426_v0 = vadd.f32 %v1320_v56, %v425_v62  ;;  %v490_v1 = vadd.f32 %v1320_v56, %v489_v63  ;;  %v818_v2 = vpop.f32.mrb[10].mxu0  ;;  %v834_v3 = vpop.f32.mrb[10].mxu1 }
 0x162   : > { %v530_v4 = vmax.f32 %v434_v60, 0.0  ;;  %v546_v5 = vmax.f32 %v498_v61, 0.0  ;;  %v437_v6 = vadd.f32 %v818_v2, %v1320_v56  ;;  %v501_v7 = vadd.f32 %v834_v3, %v1320_v56  ;;  %v428_v8 = vpop.f32.mrb[11].mxu0  ;;  %v492_v9 = vpop.f32.mrb[11].mxu1 }
 0x163   : > { %v528_v10 = vmax.f32 %v426_v0, 0.0  ;;  %v544_v11 = vmax.f32 %v490_v1, 0.0  ;;  %v429_v12 = vadd.f32 %v1320_v56, %v428_v8  ;;  %v493_v13 = vadd.f32 %v1320_v56, %v492_v9 }
 0x164   : > { %v562_v14 = vmin.f32 %v530_v4, 6.0  ;;  %v578_v15 = vmin.f32 %v546_v5, 6.0  ;;  %v531_v16 = vmax.f32 %v437_v6, 0.0  ;;  %v547_v17 = vmax.f32 %v501_v7, 0.0 }
 0x165   : > { %v560_v18 = vmin.f32 %v528_v10, 6.0  ;;  %v576_v19 = vmin.f32 %v544_v11, 6.0  ;;  %v529_v20 = vmax.f32 %v429_v12, 0.0  ;;  %v545_v21 = vmax.f32 %v493_v13, 0.0 }
 0x166   : > { %594 = vst [vmem:[%s1332_s24 + $0x50] sm:$0xff] %v562_v14  ;;  %610 = vst [vmem:[%s1332_s24 + $0xd0] sm:$0xff] %v578_v15  ;;  %v563_v22 = vmin.f32 %v531_v16, 6.0  ;;  %v579_v23 = vmin.f32 %v547_v17, 6.0 }
 0x167   : > { %592 = vst [vmem:[%s1332_s24 + $0x40] sm:$0xff] %v560_v18  ;;  %608 = vst [vmem:[%s1332_s24 + $0xc0] sm:$0xff] %v576_v19  ;;  %v561_v24 = vmin.f32 %v529_v20, 6.0  ;;  %v577_v25 = vmin.f32 %v545_v21, 6.0  ;;  %v821_v26 = vpop.f32.mrb[12].mxu0  ;;  %v837_v27 = vpop.f32.mrb[12].mxu1 }
 0x168   : > { %595 = vst [vmem:[%s1332_s24 + $0x58] sm:$0xff] %v563_v22  ;;  %611 = vst [vmem:[%s1332_s24 + $0xd8] sm:$0xff] %v579_v23  ;;  %v450_v28 = vadd.f32 %v821_v26, %v1320_v56  ;;  %v514_v29 = vadd.f32 %v837_v27, %v1320_v56  ;;  %v441_v30 = vpop.f32.mrb[13].mxu0  ;;  %v505_v31 = vpop.f32.mrb[13].mxu1 }
 0x169   : > { %593 = vst [vmem:[%s1332_s24 + $0x48] sm:$0xff] %v561_v24  ;;  %609 = vst [vmem:[%s1332_s24 + $0xc8] sm:$0xff] %v577_v25  ;;  %v442_v32 = vadd.f32 %v1320_v56, %v441_v30  ;;  %v506_v33 = vadd.f32 %v1320_v56, %v505_v31  ;;  %v822_v34 = vpop.f32.mrb[14].mxu0  ;;  %v838_v35 = vpop.f32.mrb[14].mxu1 }
 0x16a   : > { %v534_v36 = vmax.f32 %v450_v28, 0.0  ;;  %v550_v37 = vmax.f32 %v514_v29, 0.0  ;;  %v453_v38 = vadd.f32 %v822_v34, %v1320_v56  ;;  %v517_v39 = vadd.f32 %v838_v35, %v1320_v56  ;;  %v444_v40 = vpop.f32.mrb[15].mxu0  ;;  %v508_v41 = vpop.f32.mrb[15].mxu1 }
 0x16b   : > { %v532_v42 = vmax.f32 %v442_v32, 0.0  ;;  %v548_v43 = vmax.f32 %v506_v33, 0.0  ;;  %v445_v44 = vadd.f32 %v1320_v56, %v444_v40  ;;  %v509_v45 = vadd.f32 %v1320_v56, %v508_v41 }
 0x16c   : > { %v566_v46 = vmin.f32 %v534_v36, 6.0  ;;  %v582_v47 = vmin.f32 %v550_v37, 6.0  ;;  %v535_v48 = vmax.f32 %v453_v38, 0.0  ;;  %v551_v49 = vmax.f32 %v517_v39, 0.0 }
 0x16d   : > { %v564_v50 = vmin.f32 %v532_v42, 6.0  ;;  %v580_v51 = vmin.f32 %v548_v43, 6.0  ;;  %v533_v52 = vmax.f32 %v445_v44, 0.0  ;;  %v549_v53 = vmax.f32 %v509_v45, 0.0 }
 0x16e   : > { %598 = vst [vmem:[%s1332_s24 + $0x70] sm:$0xff] %v566_v46  ;;  %614 = vst [vmem:[%s1332_s24 + $0xf0] sm:$0xff] %v582_v47  ;;  %v567_v56 = vmin.f32 %v535_v48, 6.0  ;;  %v583_v54 = vmin.f32 %v551_v49, 6.0 }
 0x16f   : > { %596 = vst [vmem:[%s1332_s24 + $0x60] sm:$0xff] %v564_v50  ;;  %612 = vst [vmem:[%s1332_s24 + $0xe0] sm:$0xff] %v580_v51  ;;  %v565_v55 = vmin.f32 %v533_v52, 6.0  ;;  %v581_v57 = vmin.f32 %v549_v53, 6.0 }
 0x170   : > { %599 = vst [vmem:[%s1332_s24 + $0x78] sm:$0xff] %v567_v56  ;;  %615 = vst [vmem:[%s1332_s24 + $0xf8] sm:$0xff] %v583_v54 }
 0x171   : > { %597 = vst [vmem:[%s1332_s24 + $0x68] sm:$0xff] %v565_v55  ;;  %613 = vst [vmem:[%s1332_s24 + $0xe8] sm:$0xff] %v581_v57 }
 0x172   : > { %1013 = shalt.err (!%p1010_p5)
}
 0x173   : > { %s1014_s25 = scalar_lea.hbm %s1389_s18, 4096  ;;  %s1018_s6 = scalar_lea.hbm %s1449_s3, 8192 }
 0x174   : > { %p1015_p9 = scmp.ne.s32.totalorder %s1389_s18, %s1014_s25  ;;  %p1019_p3 = scmp.lt.u32.totalorder %s1389_s18, %s1449_s3 }
 0x175   : > { %p1020_p7 = scmp.lt.u32.totalorder %s1018_s6, %s1014_s25  ;;  %p1022_p4 = scmp.lt.u32.totalorder %s1014_s25, %s1389_s18 }
 0x176   : > { %p1016_p1 = pnand %p1015_p9, %p1213_p10 }
 0x177   : > { %p1021_p13 = por %p1020_p7, %p1019_p3 }
 0x178   : > { %p1017_p2 = pneg %p1016_p1 }
 0x179   : > { %p1023_p6 = por %p1022_p4, %p1021_p13 }
 0x17b   : > { %p1024_p8 = pnand %p1023_p6, %p1017_p2 }
 0x17d   : > { %1027 = shalt.err (!%p1024_p8)
}
 0x17e   : > { %s1095_s24 = smov 128   ;;  %s1096_s9 = smov 8  }
 0x17f   : > { %861 = dma.vmem_to_hbm [thread:$0]  (%p1213_p10), %s1391_s10, 4096, %s1389_s18, %s617_s26, %s1095_s24, %s1095_s24, %s1096_s9  }
 0x180 PF: > { %s646_s15 = sand.u32 1, %s1066_s12   ;;  %p1467_p12 = scmp.ne.s32.totalorder %s1457_s23, 0 }
 0x181   : > { %p1468_p11 = scmp.ge.s32.totalorder %s1086_s17, 2  ;;  %s647_s11 = scalar_lea.sflag [#allocation4], %s646_s15 }
 0x183   : > { %p872_p0 = pnand %p1468_p11, %p1467_p12 }
 0x185   : > { %1061 = dma.done.wait (!%p872_p0), %s647_s11, 4096  }
 0x186   : > { %1063 = vsyncadd (!%p872_p0), %s647_s11, 4294963200  ;;  %s20_s17 = sadd.s32 1, %s1086_s17   ;;  %s1469_s12 = smov %s1070_s13 }
 0x187   : > { %p17_p5 = scmp.ge.s32.totalorder %s20_s17, 4   ;;  %s1470_s13 = smov %s1074_s14 }
 0x188   : > { %s1471_s14 = smov %s1222_s5  ;;  %s1472_s15 = smov %s1082_s16 }
 0x189   : > { %s1473_s16 = smov %s1475_s28  ;;  %19 = sbr.rel (!%p17_p5) target bundleno = 7 (0x7), region = 85 }
 0x190   :  { %652 = vsyncpa [#allocation3], 1 }
 0x191   :  { %654 = vsyncpa [#allocation3 + $0x1], 1 }
 0x192   :  { %655 = vsyncpa [#allocation6], 1 }
 0x193   :  { %656 = vsyncpa [#allocation4], 1 }
 0x194   :  { %658 = vsyncpa [#allocation4 + $0x1], 1 }

</bundles_post_ra>
